<compile_context>
chip_gen: v5e
topology: v5e:2x2
jax: 0.10.0
libtpu: 0.0.40
codegen_flags: <defaults>
</compile_context>

<pallas_src>
import jax
import jax.numpy as jnp
from jax.experimental import pallas as pl
from jax.experimental.pallas import tpu as pltpu

_LANE = 128
_MIN_TILE = 32768          # ~1 MiB of f32 W per grid step at M=8
_TILE_CAP_DEFAULT = 131072  # v6e / v7x
_TILE_CAP_V5E = 65536       # keep under v5e's 16 MiB default scoped VMEM


def _tpu_flavor():
    """Best-effort chip detection; falls back to generic behavior."""
    try:
        kind = jax.devices()[0].device_kind.lower()
    except Exception:  # pragma: no cover - defensive
        return "other"
    if "7" in kind:
        return "v7x"
    if "v5" in kind:
        return "v5"
    return "other"


def _choose_tile_n(n_lanes, flavor):
    """Pick the column-tile width (multiple of 128)."""
    cap = _TILE_CAP_V5E if flavor == "v5" else _TILE_CAP_DEFAULT
    if flavor == "v7x" and n_lanes >= 2 * _MIN_TILE:
        # Two TensorCores share the parallel grid axis: use an even number of
        # tiles (equal work per TC), each as large as possible (>= 32K cols).
        num_pairs = max(1, pl.cdiv(n_lanes, 2 * cap))
        tile = pl.cdiv(n_lanes, 2 * num_pairs * _LANE) * _LANE
        return max(_LANE, int(tile))
    # Single TensorCore (v5e/v6e) or small N: one big tile up to the cap.
    return max(_LANE, min(cap, int(n_lanes)))


def _pca_decoder_kernel(xn_ref, wt_ref, b_ref, o_ref):
    # xn_ref: [B, M]   de-normalized modes (constant index_map -> VMEM resident)
    # wt_ref: [M, TN]  column tile of prepared (point-major, *1/scale) weight
    # b_ref:  [1, TN]  column tile of prepared fused bias (bias - origin)/scale
    # o_ref:  [B, TN]  column tile of the flat, point-major output
    y = jnp.dot(xn_ref[...], wt_ref[...], preferred_element_type=jnp.float32)
    o_ref[...] = (y + b_ref[...]).astype(o_ref.dtype)


def prepare_pca_decoder_params(fc1_weight, fc1_bias, mesh_origin, scale,
                               num_points, *, tile_n=None,
                               weight_dtype=jnp.float32):
    """One-time parameter preparation (hoisted out of the forward path).

    Does the point-major column reorder, origin fusion, 1/scale folding and
    zero-padding exactly once so the per-call kernel is a single streaming
    pass over the weight.
    """
    M = fc1_weight.shape[1]
    P = int(num_points)
    N = 3 * P
    inv_scale = 1.0 / float(scale)

    # coordinate-major columns (x..x|y..y|z..z) -> point-major (xyz|xyz|...)
    # so the flat kernel output reshapes straight to [B, P, 3].
    wt = fc1_weight.astype(jnp.float32).T
    wt = wt.reshape(M, 3, P).transpose(0, 2, 1).reshape(M, N)
    bias = fc1_bias.astype(jnp.float32).reshape(3, P).T.reshape(N)
    origin = jnp.tile(mesh_origin.astype(jnp.float32), P)            # [N]

    wt = wt * inv_scale
    b_fused = ((bias - origin) * inv_scale).reshape(1, N)

    flavor = _tpu_flavor()
    n_lanes = pl.cdiv(N, _LANE) * _LANE
    if tile_n is None:
        tile_n = _choose_tile_n(n_lanes, flavor)
    tile_n = int(tile_n)
    num_tiles = int(pl.cdiv(n_lanes, tile_n))
    n_pad = num_tiles * tile_n
    if n_pad != N:
        wt = jnp.pad(wt, ((0, 0), (0, n_pad - N)))
        b_fused = jnp.pad(b_fused, ((0, 0), (0, n_pad - N)))

    return dict(
        wt=wt.astype(weight_dtype),
        b_fused=b_fused.astype(weight_dtype),
        tile_n=tile_n,
        num_tiles=num_tiles,
        n=N,
        num_points=P,
        num_modes=M,
        weight_dtype=weight_dtype,
    )


def pca_decoder_forward(x, mode_spans, mode_means, params):
    """Replicates PCADecoder.forward -> [B, num_points, 3]."""
    B, M = x.shape
    assert M == params["num_modes"]
    P = params["num_points"]
    N = params["n"]
    wt = params["wt"]
    b_fused = params["b_fused"]
    tile_n = params["tile_n"]
    num_tiles = params["num_tiles"]
    wdt = params["weight_dtype"]

    # Tiny [B, M] de-normalization; the result stays VMEM-resident.
    xn = (x * mode_spans + mode_means).astype(wdt)

    # Raise scoped VMEM only when the double-buffered working set gets close
    # to v5e's 16 MiB default (irrelevant on the small shapes below).
    itemsize = jnp.finfo(wdt).bits // 8
    work = 2 * ((M + 1) * tile_n * itemsize + B * tile_n * 4)
    vmem_limit = None
    if work > 10 * 1024 * 1024:
        vmem_limit = min(48 * 1024 * 1024,
                         max(32 * 1024 * 1024, work + (8 << 20)))

    flat = pl.pallas_call(
        _pca_decoder_kernel,
        out_shape=jax.ShapeDtypeStruct((B, num_tiles * tile_n), jnp.float32),
        grid_spec=pltpu.PrefetchScalarGridSpec(
            num_scalar_prefetch=0,
            grid=(num_tiles,),
            in_specs=[
                pl.BlockSpec((B, M), lambda j: (0, 0)),        # xn (resident)
                pl.BlockSpec((M, tile_n), lambda j: (0, j)),   # W column tile
                pl.BlockSpec((1, tile_n), lambda j: (0, j)),   # fused bias tile
            ],
            out_specs=pl.BlockSpec((B, tile_n), lambda j: (0, j)),
        ),
        compiler_params=pltpu.CompilerParams(
            dimension_semantics=("parallel",),
            vmem_limit_bytes=vmem_limit),
    )(xn, wt, b_fused)

    # Point-major columns -> plain reshape (no transpose, no extra HBM pass).
    return flat[:, :N].reshape(B, P, 3)


def reference_forward(x, mode_spans, mode_means, fc1_weight, fc1_bias,
                      mesh_origin, scale, num_points):
    B = x.shape[0]
    xn = x * mode_spans + mode_means
    mp = xn @ fc1_weight.T + fc1_bias
    mp = mp.reshape(B, 3, num_points).transpose(0, 2, 1)
    return (mp - mesh_origin) / scale


if __name__ == "__main__":
    key = jax.random.PRNGKey(0)
    k_x, k_w, k_b, k_bounds, k_means = jax.random.split(key, 5)

    batch = 2
    num_modes = 8
    num_points = 128          # N = 3*128 = 384 -> single 384-wide column tile
    scale = 64

    # Deterministic synthetic parameters (shapes as in PCADecoder.__init__).
    mode_bounds = jnp.stack(
        [-jnp.abs(jax.random.uniform(k_bounds, (num_modes,))) - 1.0,
         jnp.abs(jax.random.uniform(k_bounds, (num_modes,))) + 1.0], axis=1)   # [M, 2]
    mode_spans = (mode_bounds[:, 1] - mode_bounds[:, 0]) / 2.0                 # [M]
    mode_means = jax.random.normal(k_means, (num_modes,)) * 0.1                # [M]
    mesh_origin = jnp.array([0.5, -0.25, 1.0], dtype=jnp.float32)              # [3]

    fc1_weight = jax.random.normal(k_w, (3 * num_points, num_modes),
                                   dtype=jnp.float32) * 0.05
    fc1_bias = jax.random.normal(k_b, (3 * num_points,), dtype=jnp.float32) * 0.01

    x = jax.random.normal(k_x, (batch, num_modes), dtype=jnp.float32)

    # One-time (hoisted) parameter preparation, then the streaming forward.
    params = prepare_pca_decoder_params(fc1_weight, fc1_bias, mesh_origin,
                                        scale, num_points)
    out = pca_decoder_forward(x, mode_spans, mode_means, params)
    out = jax.block_until_ready(out)

    ref = reference_forward(x, mode_spans, mode_means, fc1_weight, fc1_bias,
                            mesh_origin, scale, num_points)
    assert out.shape == (batch, num_points, 3), out.shape
    assert jnp.allclose(out, ref, atol=1e-5, rtol=1e-5), \
        float(jnp.max(jnp.abs(out - ref)))

    print("KERNEL_OK")
</pallas_src>

<mosaic_0001>
module attributes {stable_mosaic.version = 11 : i64} {
  func.func @_pca_decoder_kernel(%arg0: i32, %arg1: memref<2x8xf32, #tpu.memory_space<vmem>>, %arg2: memref<8x384xf32, #tpu.memory_space<vmem>>, %arg3: memref<1x384xf32, #tpu.memory_space<vmem>>, %arg4: memref<2x384xf32, #tpu.memory_space<vmem>>) attributes {dimension_semantics = [#tpu.dimension_semantics<parallel>], iteration_bounds = array<i64: 1>, scalar_prefetch = 0 : i64, scratch_operands = 0 : i64, tpu.core_type = #tpu.core_type<tc>, window_params = [{pipeline_mode = #tpu.pipeline_mode<synchronous>, transform_indices = @transform_0, window_bounds = array<i64: 2, 8>}, {transform_indices = @transform_1, window_bounds = array<i64: 8, 384>}, {transform_indices = @transform_2, window_bounds = array<i64: 1, 384>}, {transform_indices = @transform_3, window_bounds = array<i64: 2, 384>}]} {
    %c0 = arith.constant 0 : index
    %c0_0 = arith.constant 0 : index
    %0 = vector.load %arg1[%c0, %c0_0] : memref<2x8xf32, #tpu.memory_space<vmem>>, vector<2x8xf32>
    %c0_1 = arith.constant 0 : index
    %c0_2 = arith.constant 0 : index
    %1 = vector.load %arg2[%c0_1, %c0_2] : memref<8x384xf32, #tpu.memory_space<vmem>>, vector<8x384xf32>
    %cst = arith.constant dense<0.000000e+00> : vector<2x384xf32>
    %2 = tpu.matmul %0, %1, %cst {dimension_numbers = #tpu.dot_dimension_numbers<[1], [0], [0], [1], [0, 0, 1, 1], [], []>} : vector<2x8xf32>, vector<8x384xf32>, vector<2x384xf32> -> vector<2x384xf32>
    %c0_3 = arith.constant 0 : index
    %c0_4 = arith.constant 0 : index
    %3 = vector.load %arg3[%c0_3, %c0_4] : memref<1x384xf32, #tpu.memory_space<vmem>>, vector<1x384xf32>
    %4 = vector.broadcast %3 : vector<1x384xf32> to vector<2x384xf32>
    %5 = arith.addf %2, %4 : vector<2x384xf32>
    %c0_5 = arith.constant 0 : index
    %c0_6 = arith.constant 0 : index
    %6 = vector.load %arg4[%c0_5, %c0_6] : memref<2x384xf32, #tpu.memory_space<vmem>>, vector<2x384xf32>
    tpu.vector_store %arg4[%c0_5, %c0_6], %5 {strides = array<i32>} : memref<2x384xf32, #tpu.memory_space<vmem>>, vector<2x384xf32>,
    return
  }
  func.func @transform_0(%arg0: i32) -> (i32, i32) {
    %c0_i32 = arith.constant 0 : i32
    %c0_i32_0 = arith.constant 0 : i32
    %c0_i32_1 = arith.constant 0 : i32
    return %c0_i32, %c0_i32_0 : i32, i32
  }
  func.func @transform_1(%arg0: i32) -> (i32, i32) {
    %c0_i32 = arith.constant 0 : i32
    %c0_i32_0 = arith.constant 0 : i32
    return %c0_i32, %arg0 : i32, i32
  }
  func.func @transform_2(%arg0: i32) -> (i32, i32) {
    %c0_i32 = arith.constant 0 : i32
    %c0_i32_0 = arith.constant 0 : i32
    return %c0_i32, %arg0 : i32, i32
  }
  func.func @transform_3(%arg0: i32) -> (i32, i32) {
    %c0_i32 = arith.constant 0 : i32
    %c0_i32_0 = arith.constant 0 : i32
    return %c0_i32, %arg0 : i32, i32
  }
}

</mosaic_0001>

<bundles_post_ra>
// kernel: tpu_custom_call.1
= control target key start
LH: loop header
LB: loop body
LE: loop exit
PB: predicated region body
PF: predicated region fallthrough
CT: control target
= control target key end

     0   :  { %8 = vsyncpa [#allocation3], 0  ;;  %s306_s0 = inlined_call_operand.hbm [shape: f32[2,8], index: 0, kind: input, shape index: {}]   ;;  %s307_s1 = inlined_call_operand.hbm [shape: f32[8,384], index: 1, kind: input, shape index: {}]   ;;  %s308_s2 = inlined_call_operand.hbm [shape: f32[1,384], index: 2, kind: input, shape index: {}]   ;;  %s309_s3 = inlined_call_operand.hbm [shape: f32[2,384], index: 3, kind: output, shape index: {}]  }
   0x1   :  { %9 = vsyncpa [#allocation6], 0  ;;  %s27_s14 = sshll.u32 %s307_s1, 4  ;;  %s28_s14 = int_to_ptr.hbm [resolvable:$true] %s27_s14 }
   0x2   :  { %10 = vsyncpa [#allocation4], 0  ;;  %s270_s15 = smov [#allocation5]   ;;  %s16_s19 = sshll.u32 %s306_s0, 4  ;;  %s17_s19 = int_to_ptr.hbm [resolvable:$true] %s16_s19 }
   0x3   :  { %s29_s16 = sshll.u32 %s270_s15, 4  ;;  %s271_s20 = smov [#allocation2]   ;;  %s30_s16 = int_to_ptr.vmem [resolvable:$true] %s29_s16 }
   0x4   :  { %32 = dma.hbm_to_vmem [thread:$0]  %s28_s14, 384, %s30_s16, [#allocation6]  }
   0x5   :  { %s18_s21 = sshll.u32 %s271_s20, 4  ;;  %s38_s24 = sshll.u32 %s308_s2, 4  ;;  %s19_s21 = int_to_ptr.vmem [resolvable:$true] %s18_s21  ;;  %s39_s24 = int_to_ptr.hbm [resolvable:$true] %s38_s24 }
   0x6   :  { %21 = dma.hbm_to_vmem [thread:$0]  %s17_s19, 32, %s19_s21, [#allocation3]  }
   0x7   :  { %s272_s1 = smov [#allocation7]  }
   0x8   :  { %s40_s25 = sshll.u32 %s272_s1, 4  ;;  %s41_s25 = int_to_ptr.vmem [resolvable:$true] %s40_s25 }
   0x9   :  { %43 = dma.hbm_to_vmem [thread:$0]  %s39_s24, 48, %s41_s25, [#allocation6]  }
   0xa   :  { %264 = dma.done.wait [#allocation3], 32  }
   0xb   :  { %265 = vsyncadd [#allocation3], 4294967264 }
   0xc   :  { %266 = dma.done.wait [#allocation6], 432  }
   0xd   :  { %267 = vsyncadd [#allocation6], 4294966864  ;;  %vm68_vm0 = vcmask 64512   ;;  %v59_v0 = vld [vmem:[#allocation5 + $0x10] sm:$0xff]  ;;  %v56_v1 = vld [vmem:[#allocation2] sm:$0x3] }
   0xe   :  { %v58_v2 = vld [vmem:[#allocation5 + $0x8] sm:$0xff]  ;;  %127 = vmatpush.msra.mxu2 %v59_v0  ;;  %v57_v3 = vld [vmem:[#allocation5] sm:$0xff]  ;;  %v60_v4 = vld [vmem:[#allocation7] sm:$0x7]  ;;  %vm137_vm1 = vcmask 1041408   ;;  %s273_s0 = smov [#allocation8]  }
   0xf   :  { %107 = vmatpush.msra.mxu1 %v58_v2  ;;  %163 = vmatmul.msk.f32.vlgmr.msra.gmra.mxu2 %vm68_vm0, %v56_v1  ;;  %v63_v5 = vperm.slane %v60_v4, 1  ;;  %v62_v7 = vperm.slane %v60_v4, 0  ;;  %v64_v10 = vperm.slane %v60_v4, 2  ;;  %s148_s2 = sshll.u32 %s273_s0, 4  ;;  %s150_s28 = sshll.u32 %s309_s3, 4  ;;  %vm139_vm2 = vcmask 1043456   ;;  %s149_s2 = int_to_ptr.vmem [resolvable:$true] %s148_s2  ;;  %s151_s28 = int_to_ptr.hbm [resolvable:$true] %s150_s28 }
  0x10   :  { %162 = vmatmul.msk.f32.vlgmr.msra.gmra.mxu1 %vm68_vm0, %v56_v1  ;;  %87 = vmatpush.msra.mxu0 %v57_v3 }
  0x11   :  { %161 = vmatmul.msk.f32.vlgmr.msra.gmra.mxu0 %vm68_vm0, %v56_v1 }
  0x8d   :  { %v109_v6 = vpop.f32.mrf.mxu1 }
  0x8e   :  { %v110_v8 = vadd.f32 %v109_v6, %v63_v5  ;;  %v89_v9 = vpop.f32.mrf.mxu0 }
  0x8f   :  { %v90_v12 = vadd.f32 %v89_v9, %v62_v7 }
  0x90   :  { %v135_v11 = vrot.slane %v110_v8, 6 }
  0x92   :  { %v129_v13 = vpop.f32.mrf.mxu2  ;;  %v138_v15 = vsel %vm137_vm1, %v90_v12, %v135_v11 }
  0x93   :  { %v130_v14 = vadd.f32 %v129_v13, %v64_v10 }
  0x95   :  { %v136_v16 = vrot.slane %v130_v14, 4 }
  0x97   :  { %v140_v17 = vsel %vm139_vm2, %v138_v15, %v136_v16 }
  0x98   :  { %142 = vst [vmem:[#allocation8] sm:$0x3f] %v140_v17 }
  0x99   :  { %153 = dma.vmem_to_hbm [thread:$0]  %s149_s2, 96, %s151_s28, [#allocation4]  }
  0x9a   :  { %268 = dma.done.wait [#allocation4], 96  }
  0x9b   :  { %269 = vsyncadd [#allocation4], 4294967200 }
  0x9c   :  { %158 = vsyncpa [#allocation3], 1 }
  0x9d   :  { %159 = vsyncpa [#allocation6], 1 }
  0x9e   :  { %160 = vsyncpa [#allocation4], 1 }

</bundles_post_ra>
